<compile_context>
chip_gen: v7x
topology: tpu7x:2x2x1
jax: 0.10.0
libtpu: 0.0.40
codegen_flags: <defaults>
</compile_context>

<pallas_src>
import functools
import math

import jax
import jax.numpy as jnp
from jax.experimental import pallas as pl
from jax.experimental.pallas import tpu as pltpu


_SMALL_K_THRESHOLD = 16  # below this, skip the MXU and accumulate on the VPU
_TWO_PI = 2.0 * math.pi


# --------------------------------------------------------------------------- #
# Kernels
# --------------------------------------------------------------------------- #
def _phase(x, b, D):
    """2*pi * (x @ b) in f32.  x: (tm, D) f32, b: (D, tn) f32."""
    if D <= _SMALL_K_THRESHOLD:
        # Tiny contraction: the MXU would be <4% utilized and we'd pay push +
        # result-FIFO drain per tile; a few broadcast multiply-adds on the VPU
        # are cheaper and overlap with the EUP trig.  Tree accumulation keeps
        # the dependency chain short.
        parts = [x[:, d:d + 1] * b[d:d + 1, :] for d in range(D)]
        while len(parts) > 1:
            nxt = [parts[k] + parts[k + 1] for k in range(0, len(parts) - 1, 2)]
            if len(parts) % 2:
                nxt.append(parts[-1])
            parts = nxt
        t = parts[0]
    else:
        t = jnp.dot(x, b, preferred_element_type=jnp.float32)
    # 2*pi applied after the matmul — same op order as the torch module.
    return _TWO_PI * t


def _ffe_kernel_split(x_ref, b_ref, out_ref, *, nj, tn, D):
    """Aligned-H path.  Grid axis 1 has 2*nj steps: steps [0, nj) write cos
    tiles into columns [0, H), steps [nj, 2*nj) write sin tiles into [H, 2H).
    Only one trig path executes per step (EUP-friendly on v7x)."""
    j = pl.program_id(1)
    x = x_ref[...].astype(jnp.float32)

    col = jnp.where(j < nj, j, j - nj) * tn
    col = pl.multiple_of(col, 128)
    b = b_ref[:, pl.ds(col, tn)].astype(jnp.float32)

    ph = _phase(x, b, D)

    @pl.when(j < nj)
    def _():
        out_ref[...] = jnp.cos(ph).astype(out_ref.dtype)

    @pl.when(j >= nj)
    def _():
        out_ref[...] = jnp.sin(ph).astype(out_ref.dtype)


def _ffe_kernel_fused(x_ref, b_ref, out_ref, *, H, D):
    """Unaligned-H fallback: one full-width (tm, 2H) output block per row
    tile; cos and sin halves written with static slices (single HBM pass)."""
    x = x_ref[...].astype(jnp.float32)
    b = b_ref[...].astype(jnp.float32)
    ph = _phase(x, b, D)
    out_ref[:, :H] = jnp.cos(ph).astype(out_ref.dtype)
    out_ref[:, H:] = jnp.sin(ph).astype(out_ref.dtype)


# --------------------------------------------------------------------------- #
# Tiling heuristics
# --------------------------------------------------------------------------- #
def _round_up(a, b):
    return ((a + b - 1) // b) * b


def _row_align(dtype):
    # f32 -> 8 rows / sublane tile; bf16 -> 16; 8-bit -> 32 (packed sublanes).
    return max(8, 32 // jnp.dtype(dtype).itemsize)


def _vmem_capacity_bytes():
    try:
        return int(pltpu.get_tpu_info().vmem_capacity_bytes)
    except Exception:
        return 64 * 1024 * 1024  # assume the smallest (v7x per-TC VMEM)


def _pick_tn(H, tn_cap):
    """Largest 128-multiple divisor of H, capped (only called when H%128==0)."""
    for cand in range(min(tn_cap, H), 127, -128):
        if H % cand == 0:
            return cand
    return 128


def _pick_tm(D, col_width, H, x_bytes, out_bytes, budget, row_align, tm_cap):
    """Largest row tile (multiple of row_align, <= tm_cap) fitting the budget."""
    b_bytes = 2 * 4 * D * H  # resident B, budgeted double-buffered (worst case)
    per_row = 2 * D * x_bytes + 2 * col_width * out_bytes + 3 * col_width * 4
    avail = max(budget - b_bytes, row_align * per_row)
    tm = int(avail // per_row)
    tm = (tm // row_align) * row_align
    return max(row_align, min(tm_cap, tm))


# --------------------------------------------------------------------------- #
# Wrapper
# --------------------------------------------------------------------------- #
def fourier_feature_embedding(x, B, *, tm=None, out_dtype=None):
    """x: (N, D) array.  B: (D, H) Fourier matrix.  Returns (N, 2*H) = [cos|sin].

    out_dtype: optionally emit lower-precision outputs (e.g. jnp.bfloat16) to
    halve HBM write traffic; phase matmul and trig are always computed in f32.
    """
    N, D = x.shape
    D2, H = B.shape
    assert D == D2, "x and B contraction dims must match"
    out_dtype = x.dtype if out_dtype is None else jnp.dtype(out_dtype)

    B_f32 = B.astype(jnp.float32)
    x_bytes = jnp.dtype(x.dtype).itemsize
    out_bytes = jnp.dtype(out_dtype).itemsize

    # Generation-aware budgets: 128 MiB VMEM parts (v5e/v6e) get bigger tiles;
    # v7x (64 MiB per TC) stays conservative so both TensorCores can be fed.
    vmem_cap = _vmem_capacity_bytes()
    big_vmem = vmem_cap >= 96 * 1024 * 1024
    vmem_budget = (48 if big_vmem else 20) * 1024 * 1024
    vmem_limit = (96 if big_vmem else 40) * 1024 * 1024
    tm_cap = 2048 if big_vmem else 1024
    tn_cap = 1024 if big_vmem else 512

    split = (H % 128 == 0)
    if split:
        tn = _pick_tn(H, tn_cap)
        nj = H // tn
        col_width = tn
    else:
        # Unaligned H: single full-width block per row tile (no padding/concat;
        # lane-masked stores only at the H boundary — fine for small H).
        tn = H
        nj = 1
        col_width = 2 * H

    row_align = max(_row_align(x.dtype), _row_align(out_dtype))
    if tm is None:
        tm = _pick_tm(D, col_width, H, x_bytes, out_bytes,
                      vmem_budget, row_align, tm_cap)
    tm = max(row_align, (int(tm) // row_align) * row_align)
    tm = min(tm, _round_up(N, row_align))
    # Megacore: keep >= 2 parallel row steps when N allows, so v7x's two TCs
    # both get work even when the column axis is short (extra step ~0.35 us).
    if N > row_align:
        tm = min(tm, _round_up((N + 1) // 2, row_align))

    n_pad = _round_up(N, tm)
    x_p = x if n_pad == N else jnp.pad(x, ((0, n_pad - N), (0, 0)))

    out_shape = jax.ShapeDtypeStruct((n_pad, 2 * H), out_dtype)

    if split:
        kernel = functools.partial(_ffe_kernel_split, nj=nj, tn=tn, D=D)
        grid = (n_pad // tm, 2 * nj)
        in_specs = [
            pl.BlockSpec((tm, D), lambda i, j: (i, 0)),   # row tile of x
            pl.BlockSpec((D, H), lambda i, j: (0, 0)),    # B fully VMEM-resident
        ]
        out_specs = pl.BlockSpec((tm, tn), lambda i, j: (i, j))
        dim_sem = ("parallel", "parallel")
    else:
        kernel = functools.partial(_ffe_kernel_fused, H=H, D=D)
        grid = (n_pad // tm,)
        in_specs = [
            pl.BlockSpec((tm, D), lambda i: (i, 0)),
            pl.BlockSpec((D, H), lambda i: (0, 0)),
        ]
        out_specs = pl.BlockSpec((tm, 2 * H), lambda i: (i, 0))
        dim_sem = ("parallel",)

    y = pl.pallas_call(
        kernel,
        out_shape=out_shape,
        grid_spec=pltpu.PrefetchScalarGridSpec(
            num_scalar_prefetch=0,
            grid=grid,
            in_specs=in_specs,
            out_specs=out_specs,
        ),
        compiler_params=pltpu.CompilerParams(
            dimension_semantics=dim_sem,
            vmem_limit_bytes=vmem_limit,
        ),
    )(x_p, B_f32)

    return y[:N] if n_pad != N else y


# --------------------------------------------------------------------------- #
# Reference + demo
# --------------------------------------------------------------------------- #
def _reference(x, B):
    # Faithful to the torch forward: mm, then cos/sin of 2*pi*out, concat.
    t = x @ B.astype(x.dtype)
    return jnp.concatenate(
        [jnp.cos(2.0 * jnp.pi * t), jnp.sin(2.0 * jnp.pi * t)], axis=-1
    )


if __name__ == "__main__":
    key = jax.random.PRNGKey(0)
    k1, k2, k3, k4 = jax.random.split(key, 4)

    # --- Case 1: module-sized demo (input_dim=4, output_dim=32 -> H=16, N=8).
    #     Exercises the fused (unaligned-H) path.
    input_dimension, output_dimension, sigma, N = 4, 32, 10.0, 8
    x = jax.random.normal(k1, (N, input_dimension), dtype=jnp.float32)
    # torch.rand(...) * sigma  ->  Uniform[0, 1) * sigma
    Bm = jax.random.uniform(
        k2, (input_dimension, output_dimension // 2), dtype=jnp.float32
    ) * sigma
    y = jax.block_until_ready(fourier_feature_embedding(x, Bm))
    y_ref = _reference(x, Bm)
    assert y.shape == (N, output_dimension)
    # f32 matmul accumulation-order differences are amplified by the large
    # phase arguments fed to cos/sin (sigma=10), hence the 1e-3 tolerance.
    assert jnp.allclose(y, y_ref, atol=1e-3, rtol=1e-3), "case 1 mismatch vs ref"

    # --- Case 2: 128-aligned H exercises the lane-dense split path
    #     (pl.when-gated cos/sin steps, resident-B dynamic column slicing,
    #     row padding for ragged N).
    input_dimension2, output_dimension2, sigma2, N2 = 4, 4096, 1.0, 24
    x2 = jax.random.normal(k3, (N2, input_dimension2), dtype=jnp.float32)
    B2 = jax.random.uniform(
        k4, (input_dimension2, output_dimension2 // 2), dtype=jnp.float32
    ) * sigma2
    y2 = jax.block_until_ready(fourier_feature_embedding(x2, B2))
    y2_ref = _reference(x2, B2)
    assert y2.shape == (N2, output_dimension2)
    assert jnp.allclose(y2, y2_ref, atol=1e-3, rtol=1e-3), "case 2 mismatch vs ref"

    print("KERNEL_OK")
</pallas_src>

<mosaic_0001>
module attributes {stable_mosaic.version = 11 : i64} {
  func.func @_ffe_kernel_fused(%arg0: i32, %arg1: memref<8x4xf32, #tpu.memory_space<vmem>>, %arg2: memref<4x16xf32, #tpu.memory_space<vmem>>, %arg3: memref<8x32xf32, #tpu.memory_space<vmem>>) attributes {dimension_semantics = [#tpu.dimension_semantics<parallel>], iteration_bounds = array<i64: 1>, scalar_prefetch = 0 : i64, scratch_operands = 0 : i64, tpu.core_type = #tpu.core_type<tc>, window_params = [{transform_indices = @transform_0, window_bounds = array<i64: 8, 4>}, {pipeline_mode = #tpu.pipeline_mode<synchronous>, transform_indices = @transform_1, window_bounds = array<i64: 4, 16>}, {transform_indices = @transform_2, window_bounds = array<i64: 8, 32>}]} {
    %c0 = arith.constant 0 : index
    %c0_0 = arith.constant 0 : index
    %0 = vector.load %arg1[%c0, %c0_0] : memref<8x4xf32, #tpu.memory_space<vmem>>, vector<8x4xf32>
    %c0_1 = arith.constant 0 : index
    %c0_2 = arith.constant 0 : index
    %1 = vector.load %arg2[%c0_1, %c0_2] : memref<4x16xf32, #tpu.memory_space<vmem>>, vector<4x16xf32>
    %2 = vector.extract_strided_slice %0 {offsets = [0, 0], sizes = [8, 1], strides = [1, 1]} : vector<8x4xf32> to vector<8x1xf32>
    %3 = vector.extract_strided_slice %1 {offsets = [0, 0], sizes = [1, 16], strides = [1, 1]} : vector<4x16xf32> to vector<1x16xf32>
    %4 = vector.broadcast %2 : vector<8x1xf32> to vector<8x16xf32>
    %5 = vector.broadcast %3 : vector<1x16xf32> to vector<8x16xf32>
    %6 = arith.mulf %4, %5 : vector<8x16xf32>
    %7 = vector.extract_strided_slice %0 {offsets = [0, 1], sizes = [8, 1], strides = [1, 1]} : vector<8x4xf32> to vector<8x1xf32>
    %8 = vector.extract_strided_slice %1 {offsets = [1, 0], sizes = [1, 16], strides = [1, 1]} : vector<4x16xf32> to vector<1x16xf32>
    %9 = vector.broadcast %7 : vector<8x1xf32> to vector<8x16xf32>
    %10 = vector.broadcast %8 : vector<1x16xf32> to vector<8x16xf32>
    %11 = arith.mulf %9, %10 : vector<8x16xf32>
    %12 = vector.extract_strided_slice %0 {offsets = [0, 2], sizes = [8, 1], strides = [1, 1]} : vector<8x4xf32> to vector<8x1xf32>
    %13 = vector.extract_strided_slice %1 {offsets = [2, 0], sizes = [1, 16], strides = [1, 1]} : vector<4x16xf32> to vector<1x16xf32>
    %14 = vector.broadcast %12 : vector<8x1xf32> to vector<8x16xf32>
    %15 = vector.broadcast %13 : vector<1x16xf32> to vector<8x16xf32>
    %16 = arith.mulf %14, %15 : vector<8x16xf32>
    %17 = vector.extract_strided_slice %0 {offsets = [0, 3], sizes = [8, 1], strides = [1, 1]} : vector<8x4xf32> to vector<8x1xf32>
    %18 = vector.extract_strided_slice %1 {offsets = [3, 0], sizes = [1, 16], strides = [1, 1]} : vector<4x16xf32> to vector<1x16xf32>
    %19 = vector.broadcast %17 : vector<8x1xf32> to vector<8x16xf32>
    %20 = vector.broadcast %18 : vector<1x16xf32> to vector<8x16xf32>
    %21 = arith.mulf %19, %20 : vector<8x16xf32>
    %22 = arith.addf %6, %11 : vector<8x16xf32>
    %23 = arith.addf %16, %21 : vector<8x16xf32>
    %24 = arith.addf %22, %23 : vector<8x16xf32>
    %cst = arith.constant 6.28318548 : f32
    %25 = vector.broadcast %cst : f32 to vector<8x16xf32>
    %26 = arith.mulf %25, %24 : vector<8x16xf32>
    %27 = math.cos %26 : vector<8x16xf32>
    %c0_3 = arith.constant 0 : index
    %c0_4 = arith.constant 0 : index
    %28 = vector.load %arg3[%c0_3, %c0_4] : memref<8x32xf32, #tpu.memory_space<vmem>>, vector<8x16xf32>
    tpu.vector_store %arg3[%c0_3, %c0_4], %27 {strides = array<i32>} : memref<8x32xf32, #tpu.memory_space<vmem>>, vector<8x16xf32>,
    %29 = math.sin %26 : vector<8x16xf32>
    %c0_5 = arith.constant 0 : index
    %c16 = arith.constant 16 : index
    %30 = vector.load %arg3[%c0_5, %c16] : memref<8x32xf32, #tpu.memory_space<vmem>>, vector<8x16xf32>
    tpu.vector_store %arg3[%c0_5, %c16], %29 {strides = array<i32>} : memref<8x32xf32, #tpu.memory_space<vmem>>, vector<8x16xf32>,
    return
  }
  func.func @transform_0(%arg0: i32) -> (i32, i32) {
    %c0_i32 = arith.constant 0 : i32
    %c0_i32_0 = arith.constant 0 : i32
    return %arg0, %c0_i32 : i32, i32
  }
  func.func @transform_1(%arg0: i32) -> (i32, i32) {
    %c0_i32 = arith.constant 0 : i32
    %c0_i32_0 = arith.constant 0 : i32
    %c0_i32_1 = arith.constant 0 : i32
    return %c0_i32, %c0_i32_0 : i32, i32
  }
  func.func @transform_2(%arg0: i32) -> (i32, i32) {
    %c0_i32 = arith.constant 0 : i32
    %c0_i32_0 = arith.constant 0 : i32
    return %arg0, %c0_i32 : i32, i32
  }
}

</mosaic_0001>

<bundles_post_ra>
// kernel: tpu_custom_call.1
= control target key start
LH: loop header
LB: loop body
LE: loop exit
PB: predicated region body
PF: predicated region fallthrough
CT: control target
= control target key end

     0   :  { %v341_v1 = vmov 2   ;;  %v342_v2 = vmov 0   ;;  %s408_s0 = inlined_call_operand.vmem [shape: f32[8,4], index: 0, kind: input, shape index: {}]   ;;  %s409_s1 = inlined_call_operand.vmem [shape: f32[4,16], index: 1, kind: input, shape index: {}]   ;;  %s410_s2 = inlined_call_operand.hbm [shape: f32[8,32], index: 2, kind: output, shape index: {}]  }
   0x1   :  { %v12_v0 = vld [vmem:[%s408_s0] sm:$0xff]  ;;  %310 = vset.pattern.permute.xlu1 %v341_v1  ;;  %308 = vset.pattern.permute.xlu0 %v342_v2 }
   0x2   :  { %7 = vsyncpa [#allocation3], 0  ;;  %34 = vperm.xlu1 %310, %v12_v0   ;;  %16 = vperm.xlu0 %308, %v12_v0   ;;  %v343_v3 = vmov 3   ;;  %v344_v4 = vmov 1   ;;  %v19_v5 = vlaneseq  ;;  %v13_v11 = vld [vmem:[%s409_s1] sm:$0xf] }
   0x3   :  { %v345_v38 = vmov 683565275   ;;  %v346_v40 = vmov 2475754826   ;;  %v347_v43 = vmov 2131351028  }
   0x4   :  { %v20_v6 = vshrl.u32 %v19_v5, 7  ;;  %v348_v46 = vmov 2102212464   ;;  %v349_v49 = vmov 920167782   ;;  %vm158_vm11 = vcmask 130048  }
   0x5   :  { %v350_v52 = vmov 1326507024   ;;  %s351_s1 = smov 16   ;;  %s352_s12 = smov [#allocation2]  }
   0x6   :  { %311 = vset.pattern.permute.xlu1 %v343_v3  ;;  %309 = vset.pattern.permute.xlu0 %v344_v4  ;;  %v39_v7 = vsub.s32 2, %v20_v6  ;;  %v21_v8 = vsub.s32 0, %v20_v6  ;;  %v48_v9 = vsub.s32 3, %v20_v6  ;;  %v30_v10 = vsub.s32 1, %v20_v6  ;;  %s276_s13 = sshll.u32 %s352_s12, 4  ;;  %s277_s13 = int_to_ptr.vmem [resolvable:$true] %s276_s13 }
   0x7   :  { %43 = vperm.xlu1 %311, %v12_v0   ;;  %25 = vperm.xlu0 %309, %v12_v0   ;;  %s317_s14 = scalar_lea.vmem %s277_s13, 128  ;;  %p322_p1 = scmp.lt.s32.totalorder %s277_s13, %s277_s13 }
   0x8   :  { %v40_v14 = vrot.slane %v13_v11, %v39_v7  ;;  %v22_v15 = vrot.slane %v13_v11, %v21_v8  ;;  %v49_v16 = vrot.slane %v13_v11, %v48_v9  ;;  %v31_v17 = vrot.slane %v13_v11, %v30_v10  ;;  %p318_p0 = scmp.ne.s32.totalorder %s277_s13, %s317_s14  ;;  %p323_p2 = scmp.lt.s32.totalorder %s317_s14, %s317_s14 }
   0xa   :  { %p324_p3 = por %p323_p2, %p322_p1 }
   0xb   :  { %312 = vset.pattern.permute.xlu0 %v343_v3 }
   0xc   :  { %p325_p4 = pnand %p324_p3, %p318_p0 }
  0x81   :  { %v35_v12 = vpop.permute.xlu1 %34  ;;  %v17_v13 = vpop.permute.xlu0 %16 }
  0x82   :  { %v41_v20 = vmul.f32 %v40_v14, %v35_v12  ;;  %v23_v21 = vmul.f32 %v22_v15, %v17_v13 }
  0x86   :  { %v44_v18 = vpop.permute.xlu1 %43  ;;  %v26_v19 = vpop.permute.xlu0 %25 }
  0x87   :  { %v50_v22 = vmul.f32 %v49_v16, %v44_v18  ;;  %v32_v23 = vmul.f32 %v31_v17, %v26_v19 }
  0x89   :  { %v52_v24 = vadd.f32 %v50_v22, %v41_v20  ;;  %v51_v25 = vadd.f32 %v32_v23, %v23_v21 }
  0x8b   :  { %v53_v26 = vadd.f32 %v52_v24, %v51_v25 }
  0x8d   :  { %v374_v27 = vmul.f32 6.2831855, %v53_v26 }
  0x8f   :  { %v58_v28 = vand.u32 2139095040, %v374_v27  ;;  %v55_v32 = vand.u32 2147483647, %v374_v27  ;;  %vm57_vm7 = vcmp.lt.s32.totalorder %v374_v27, 0 }
  0x91   :  { %v59_v29 = vshrl.u32 %v58_v28, 23  ;;  %v62_v36 = vand.u32 8388607, %v55_v32  ;;  %vm56_vm8 = vcmp.le.f32.partialorder %v55_v32, 0.7853982 }
  0x93   :  { %v284_v30 = vadd.s32 4294967169, %v59_v29  ;;  %v63_v54 = vor.u32 8388608, %v62_v36 }
  0x95   :  { %v65_v31 = vadd.s32 1, %v284_v30  ;;  %v103_v4 = vshll.u32 %v63_v54, 8 }
  0x97   :  { %vm66_vm0 = vcmp.gt.s32.totalorder %v65_v31, 0 }
  0x98   :  { %v67_v33 = vsel %vm66_vm0, %v65_v31, 0  ;;  %vm147_vm0 = vweird.f32 %v374_v27 }
  0x99   :  { %v69_v34 = vand.u32 31, %v67_v33  ;;  %v68_v37 = vshrl.u32 %v67_v33, 5 }
  0x9b   :  { %v70_v35 = vsub.s32 32, %v69_v34  ;;  %v72_v39 = vshll.u32 %v345_v38, %v69_v34  ;;  %v75_v41 = vshll.u32 %v346_v40, %v69_v34  ;;  %v78_v45 = vshll.u32 %v347_v43, %v69_v34 }
  0x9c   :  { %v81_v48 = vshll.u32 %v348_v46, %v69_v34  ;;  %v84_v51 = vshll.u32 %v349_v49, %v69_v34  ;;  %vm87_vm1 = vcmp.lt.s32.totalorder %v68_v37, 1  ;;  %vm90_vm2 = vcmp.lt.s32.totalorder %v68_v37, 4 }
  0x9d   :  { %v73_v42 = vshrl.u32 %v346_v40, %v70_v35  ;;  %v76_v44 = vshrl.u32 %v347_v43, %v70_v35  ;;  %v79_v47 = vshrl.u32 %v348_v46, %v70_v35  ;;  %v82_v50 = vshrl.u32 %v349_v49, %v70_v35 }
  0x9e   :  { %v85_v53 = vshrl.u32 %v350_v52, %v70_v35  ;;  %v71_v63 = vshrl.u32 %v345_v38, %v70_v35  ;;  %vm89_vm3 = vcmp.lt.s32.totalorder %v68_v37, 3  ;;  %vm88_vm4 = vcmp.lt.s32.totalorder %v68_v37, 2 }
  0x9f   :  { %v74_v55 = vor.u32 %v73_v42, %v72_v39  ;;  %v77_v56 = vor.u32 %v76_v44, %v75_v41  ;;  %v80_v57 = vor.u32 %v79_v47, %v78_v45  ;;  %v83_v58 = vor.u32 %v82_v50, %v81_v48 }
  0xa0   :  { %v86_v59 = vor.u32 %v85_v53, %v84_v51 }
  0xa1   :  { %v92_v60 = vsel %vm90_vm2, %v80_v57, 2102212464  ;;  %v95_v61 = vsel %vm87_vm1, %v74_v55, %v77_v56  ;;  %v99_v62 = vsel %vm87_vm1, %v77_v56, %v80_v57  ;;  %v96_v0 = vsel %vm90_vm2, %v83_v58, 920167782 }
  0xa2   :  { %v100_v1 = vsel %vm90_vm2, %v86_v59, 1326507024  ;;  %v97_v2 = vsel %vm89_vm3, %v80_v57, %v96_v0  ;;  %v91_v5 = vsel %vm87_vm1, %v71_v63, %v74_v55  ;;  %v93_v6 = vsel %vm89_vm3, %v77_v56, %v92_v60 }
  0xa3   :  { %v101_v3 = vsel %vm89_vm3, %v83_v58, %v100_v1  ;;  %v98_v7 = vsel %vm88_vm4, %v95_v61, %v97_v2  ;;  %v94_v13 = vsel %vm88_vm4, %v91_v5, %v93_v6  ;;  %vm268_vm1 = vcmask 261248  }
  0xa4   :  { %v102_v8 = vsel %vm88_vm4, %v99_v62, %v101_v3  ;;  %v383_v11 = vmul.u32.u64.low %v103_v4, %v98_v7  ;;  %v384_v12 = vmul.u32.u64.high %v103_v4, %v98_v7, %v383_v11  ;;  %v110_v15 = vmul.u32 %v103_v4, %v94_v13 }
  0xa5   :  { %v380_v9 = vmul.u32.u64.low %v103_v4, %v102_v8  ;;  %v381_v10 = vmul.u32.u64.high %v103_v4, %v102_v8, %v380_v9 }
  0xa6   :  { %v113_v14 = vadd.s32 1, %v384_v12 }
  0xa7   :  { %vm112_vm5 = vc.u32 %v381_v10, %v383_v11  ;;  %v111_v28 = vadd.s32 %v383_v11, %v381_v10 }
  0xa8   :  { %v114_v16 = vsel %vm112_vm5, %v113_v14, %v384_v12 }
  0xa9   :  { %v115_v17 = vadd.s32 %v114_v16, %v110_v15 }
  0xab   :  { %v116_v18 = vadd.s32 536870912, %v115_v17 }
  0xad   :  { %v117_v19 = vshrl.u32 %v116_v18, 30 }
  0xaf   :  { %v118_v20 = vshll.u32 %v117_v19, 30  ;;  %v141_v41 = vsub.s32 4, %v117_v19 }
  0xb1   :  { %v119_v21 = vsub.s32 %v115_v17, %v118_v20  ;;  %v142_v44 = vsel %vm57_vm7, %v141_v41, %v117_v19 }
  0xb2   :  { %v144_v46 = vsel %vm56_vm8, 0, %v142_v44 }
  0xb3   :  { %v121_v22 = vsub.s32 0, %v119_v21  ;;  %v253_v47 = vadd.s32 3, %v144_v46  ;;  %v148_v48 = vand.u32 3, %v144_v46 }
  0xb5   :  { %v285_v23 = vmin.u32 %v121_v22, %v119_v21  ;;  %v254_v49 = vand.u32 3, %v253_v47  ;;  %vm153_vm9 = vcmp.eq.s32.totalorder %v148_v48, 2  ;;  %vm150_vm12 = vcmp.eq.s32.totalorder %v148_v48, 0 }
  0xb6   :  { %vm149_vm14 = vcmp.lt.s32.totalorder %v148_v48, 2 }
  0xb7   :  { %v123_v24 = vclz %v285_v23  ;;  %vm259_vm10 = vcmp.eq.s32.totalorder %v254_v49, 2  ;;  %vm256_vm13 = vcmp.eq.s32.totalorder %v254_v49, 0  ;;  %vm255_vm15 = vcmp.lt.s32.totalorder %v254_v49, 2 }
  0xb9   :  { %v286_v25 = vadd.s32 4294967294, %v123_v24 }
  0xbb   :  { %vm287_vm6 = vcmp.lt.s32.totalorder %v286_v25, 0 }
  0xbc   :  { %v126_v26 = vsel %vm287_vm6, 0, %v286_v25 }
  0xbd   :  { %v127_v29 = vsub.s32 32, %v126_v26  ;;  %v131_v30 = vsub.s32 4294967266, %v126_v26  ;;  %v128_v31 = vshll.u32 %v119_v21, %v126_v26 }
  0xbf   :  { %v129_v33 = vshrl.u32 %v111_v28, %v127_v29  ;;  %v132_v34 = vadd.s32 127, %v131_v30 }
  0xc1   :  { %v130_v35 = vor.u32 %v129_v33, %v128_v31  ;;  %v133_v36 = vshll.u32 %v132_v34, 23 }
  0xc3   :  { %v134_v37 = vor.u32 4788187, %v133_v36  ;;  %v137_v39 = vcvt.s32.f32 %v130_v35 }
  0xc5   :  { %v135_v38 = vand.u32 2147483647, %v134_v37 }
  0xc7   :  { %v138_v40 = vmul.f32 %v137_v39, %v135_v38 }
  0xc9   :  { %v139_v42 = vxor.u32 2147483648, %v138_v40 }
  0xcb   :  { %v140_v43 = vsel %vm57_vm7, %v139_v42, %v138_v40 }
  0xcc   :  { %v143_v45 = vsel %vm56_vm8, %v374_v27, %v140_v43 }
  0xcd   :  { %313 = vcosq.f32 %v143_v45 }
  0xce   :  { %315 = vsinq.f32 %v143_v45 }
  0xd7   :  { %v314_v50 = vpop.eup %313 }
  0xd8   :  { %v316_v51 = vpop.eup %315  ;;  %v154_v52 = vxor.u32 2147483648, %v314_v50 }
  0xd9   :  { %v151_v53 = vxor.u32 2147483648, %v316_v51 }
  0xda   :  { %v261_v32 = vsel %vm259_vm10, %v154_v52, %v316_v51  ;;  %v155_v54 = vsel %vm153_vm9, %v154_v52, %v316_v51 }
  0xdb   :  { %v258_v55 = vsel %vm256_vm13, %v314_v50, %v151_v53  ;;  %v152_v56 = vsel %vm150_vm12, %v314_v50, %v151_v53 }
  0xdc   :  { %v262_v57 = vsel %vm255_vm15, %v258_v55, %v261_v32  ;;  %v156_v58 = vsel %vm149_vm14, %v152_v56, %v155_v54 }
  0xdd   :  { %v263_v59 = vsel %vm147_vm0, nan, %v262_v57  ;;  %v157_v60 = vsel %vm147_vm0, nan, %v156_v58 }
  0xde   :  { %265 = vrot.lane.b32.xlu1 %v263_v59, %s351_s1  ;;  %159 = vst.msk [vmem:[#allocation2] sm:$0xff] %vm158_vm11, %v157_v60 }
 0x150   :  { %v266_v61 = vpop.permute.xlu1 %265 }
 0x151   :  { %269 = vst.msk [vmem:[#allocation2] sm:$0xff] %vm268_vm1, %v266_v61 }
 0x152   :  { %328 = shalt.err (!%p325_p4)
}
 0x153   :  { %s329_s17 = scalar_lea.hbm %s410_s2, 128 }
 0x154   :  { %p330_p5 = scmp.ne.s32.totalorder %s410_s2, %s329_s17  ;;  %p333_p6 = scmp.lt.u32.totalorder %s329_s17, %s410_s2 }
 0x156   :  { %p335_p7 = pnand %p333_p6, %p330_p5 }
 0x158   :  { %338 = shalt.err (!%p335_p7)
}
 0x159   :  { %279 = dma.vmem_to_hbm [thread:$0]  %s277_s13, 128, %s410_s2, [#allocation3]  }
 0x15a   :  { %339 = dma.done.wait [#allocation3], 128  }
 0x15b   :  { %340 = vsyncadd [#allocation3], 4294967168 }
 0x15c   :  { %283 = vsyncpa [#allocation3], 1 }

</bundles_post_ra>
